<compile_context>
chip_gen: v7x
topology: tpu7x:2x2x1
jax: 0.10.0
libtpu: 0.0.40
codegen_flags: <defaults>
</compile_context>

<pallas_src>
import functools

import jax
import jax.numpy as jnp
from jax.experimental import pallas as pl
from jax.experimental.pallas import tpu as pltpu

# ----- logical model dimensions (synthetic, deterministic) -----
INPUT_SIZE = 16
HIDDEN = (32, 32, 32, 32)
OUTPUT_SIZE = 1

# ----- padded ("physical") width for lane-dense layout -----
H_PAD = 128               # hidden 32 -> 128 (lane-dense activations, full MXU K/N)
_DEFAULT_TILE_ROWS = 4096  # default batch tile; sweep 2048-8192 per generation


# --------------------------------------------------------------------------- kernel
def _mlp_kernel(x_ref,
                w1_ref, b1_ref, w2_ref, b2_ref, w3_ref, b3_ref, w4_ref, b4_ref,
                w5r_ref, b5_ref, out_ref, *, compute_dtype):
    """One batch tile: fused (Linear -> ReLU) x4 -> Linear with packed output.

    x_ref:   (tile_rows, INPUT_SIZE) f32   -- cast to compute_dtype in-kernel
    w*_ref:  padded weights in compute_dtype, b*_ref: (1, 128) f32
    w5r_ref: (8, 128) compute_dtype, row 0 = final weight column, rows 1..7 zero
    b5_ref:  (1, 128) f32, final bias replicated across all lanes
    out_ref: (tile_rows // 128, 128) f32   -- out[j, b] = output of batch row j*128+b
    """
    h = x_ref[...].astype(compute_dtype)                       # in-kernel cast (free on VPU)
    for w_ref, b_ref in ((w1_ref, b1_ref), (w2_ref, b2_ref),
                         (w3_ref, b3_ref), (w4_ref, b4_ref)):
        a = jnp.dot(h, w_ref[...],
                    preferred_element_type=jnp.float32) + b_ref[...]
        h = jnp.maximum(a, 0.0).astype(compute_dtype)           # bias/ReLU in f32

    # Final layer + repack: per 128-row batch sub-block, put the scalar outputs on
    # the lane axis so HBM writeback only carries real data.
    w5r = w5r_ref[...]                                          # (8, 128)
    b5 = b5_ref[...]                                            # (1, 128) f32
    n_sub = h.shape[0] // 128                                   # static
    for j in range(n_sub):                                      # static unroll
        hj = h[j * 128:(j + 1) * 128, :]                        # (128, 128)
        # y[o, b] = sum_d w5r[o, d] * hj[b, d]  (transposed-RHS matmul on the MXU)
        yj = jnp.einsum('od,bd->ob', w5r, hj,
                        preferred_element_type=jnp.float32)     # (8, 128); row 0 real
        out_ref[j:j + 1, :] = yj[0:1, :] + b5


# --------------------------------------------------------------------------- wrapper
def _choose_tile_groups(n_groups, tile_batch):
    """Pick the batch-tile size in units of 128-row groups."""
    req = max(1, int(tile_batch or _DEFAULT_TILE_ROWS) // 128)
    if n_groups <= req:
        # Whole batch fits in one tile.  If it is big enough, split in two so the
        # v7x megacore (2 TCs, "parallel" grid axis) gets >= 2 batch tiles.
        if n_groups >= 16 and n_groups % 16 == 0:
            return n_groups // 2
        return n_groups
    # Multi-step grid: tile must be a multiple of 8 groups so the packed output
    # block's second-minor dim satisfies the (8, 128) tiling constraint.
    return min(n_groups, max(8, (req // 8) * 8))


def prepare_params(params, compute_dtype=jnp.bfloat16):
    """Zero-pad weights/biases ONCE at init to lane-dense widths.

    w1..w4 -> (fan_in_pad, 128) compute_dtype; b1..b4 -> (1, 128) f32.
    Final layer stored as a row w5r (8, 128) (row 0 = w5[:, 0], rest zero) so the
    kernel can land the batch index on lanes; b5 -> (1, 128) f32 replicated.
    """
    pad_in = (INPUT_SIZE, H_PAD, H_PAD, H_PAD)
    out = {}
    for i in range(4):
        w = params[f"w{i + 1}"]
        b = params[f"b{i + 1}"]
        fan_in, fan_out = w.shape
        wp = jnp.zeros((pad_in[i], H_PAD), jnp.float32).at[:fan_in, :fan_out].set(w)
        bp = jnp.zeros((1, H_PAD), jnp.float32).at[:, :fan_out].set(b)
        out[f"w{i + 1}"] = wp.astype(compute_dtype)
        out[f"b{i + 1}"] = bp
    w5 = params["w5"]                                           # (HIDDEN[-1], 1)
    w5r = jnp.zeros((8, H_PAD), jnp.float32).at[0, :w5.shape[0]].set(w5[:, 0])
    out["w5r"] = w5r.astype(compute_dtype)
    out["b5"] = jnp.full((1, H_PAD), params["b5"][0, 0], jnp.float32)
    return out


def simple_nn_4hidden(x, padded_params, *, tile_batch=None,
                      compute_dtype=jnp.bfloat16):
    """x: (batch, INPUT_SIZE) f32. padded_params: output of prepare_params()."""
    batch = x.shape[0]
    n_groups = pl.cdiv(batch, 128)              # number of 128-row output groups
    padded_batch = n_groups * 128
    if padded_batch != batch:                   # <= 127 rows; no-op when batch % 128 == 0
        x = jnp.pad(x, ((0, padded_batch - batch), (0, 0)))

    tile_groups = _choose_tile_groups(n_groups, tile_batch)
    tile_rows = tile_groups * 128
    grid = (pl.cdiv(n_groups, tile_groups),)    # ragged last tile -> Pallas boundary masking

    def batch_map(i):        # x / packed-out: march down the batch axis
        return (i, 0)

    def resident_map(i):     # weights/biases: same block every step -> DMA'd once
        return (0, 0)

    args = (x,
            padded_params["w1"], padded_params["b1"],
            padded_params["w2"], padded_params["b2"],
            padded_params["w3"], padded_params["b3"],
            padded_params["w4"], padded_params["b4"],
            padded_params["w5r"], padded_params["b5"])

    in_specs = [pl.BlockSpec((tile_rows, INPUT_SIZE), batch_map)]
    for a in args[1:]:
        # Resident params (~135 KB total); double-buffering them is harmless here,
        # so we skip pipeline_mode=pl.Buffered(1) in favor of maximum robustness.
        in_specs.append(pl.BlockSpec(a.shape, resident_map))

    out_spec = pl.BlockSpec((tile_groups, H_PAD), batch_map)

    # Honest cost hint: tiny flops, mostly HBM traffic on x + packed output + params.
    param_bytes = sum(int(a.size) * a.dtype.itemsize for a in args[1:])
    cost = pl.CostEstimate(
        flops=int(2 * padded_batch
                  * (INPUT_SIZE * H_PAD + 3 * H_PAD * H_PAD + 8 * H_PAD)),
        transcendentals=0,
        bytes_accessed=int(padded_batch * INPUT_SIZE * 4
                           + n_groups * H_PAD * 4 + param_bytes))

    out_packed = pl.pallas_call(
        functools.partial(_mlp_kernel, compute_dtype=compute_dtype),
        out_shape=jax.ShapeDtypeStruct((n_groups, H_PAD), jnp.float32),
        grid=grid,
        in_specs=in_specs,
        out_specs=out_spec,
        compiler_params=pltpu.CompilerParams(
            dimension_semantics=("parallel",)),   # v7x: shard batch tiles over 2 TCs
        cost_estimate=cost,
    )(*args)

    # (n_groups, 128) row-major is exactly batch order; strip tail, restore (batch, 1).
    return out_packed.reshape(-1)[:batch].reshape(batch, OUTPUT_SIZE)


# --------------------------------------------------------------------------- init & refs
def init_params(key):
    """Deterministic init mimicking nn.Linear default (uniform +/- 1/sqrt(fan_in))."""
    sizes = [(INPUT_SIZE, HIDDEN[0]), (HIDDEN[0], HIDDEN[1]),
             (HIDDEN[1], HIDDEN[2]), (HIDDEN[2], HIDDEN[3]),
             (HIDDEN[3], OUTPUT_SIZE)]
    params = {}
    keys = jax.random.split(key, 2 * len(sizes))
    for i, (fan_in, fan_out) in enumerate(sizes):
        bound = 1.0 / jnp.sqrt(jnp.float32(fan_in))
        params[f"w{i + 1}"] = jax.random.uniform(
            keys[2 * i], (fan_in, fan_out), jnp.float32, -bound, bound)
        params[f"b{i + 1}"] = jax.random.uniform(
            keys[2 * i + 1], (1, fan_out), jnp.float32, -bound, bound)
    return params


def reference_forward_f32(x, params):
    h = x
    for i in range(1, 5):
        h = jnp.maximum(h @ params[f"w{i}"] + params[f"b{i}"], 0.0)
    return h @ params["w5"] + params["b5"]


def reference_forward_compute_dtype(x, params, compute_dtype=jnp.bfloat16):
    """Mirrors the kernel's numerics: bf16 operands, f32 accumulation/bias/ReLU."""
    h = x
    for i in range(1, 5):
        a = jnp.dot(h.astype(compute_dtype),
                    params[f"w{i}"].astype(compute_dtype),
                    preferred_element_type=jnp.float32) + params[f"b{i}"]
        h = jnp.maximum(a, 0.0)
    return jnp.dot(h.astype(compute_dtype),
                   params["w5"].astype(compute_dtype),
                   preferred_element_type=jnp.float32) + params["b5"]


# --------------------------------------------------------------------------- demo
if __name__ == "__main__":
    key = jax.random.PRNGKey(0)
    kx, kp = jax.random.split(key)

    params = init_params(kp)
    padded_params = prepare_params(params, compute_dtype=jnp.bfloat16)

    # Case 1: small demo batch (multiple of 128 -> no wrapper-side padding at all).
    BATCH = 256
    x = jax.random.normal(kx, (BATCH, INPUT_SIZE), jnp.float32)
    out = jax.block_until_ready(simple_nn_4hidden(x, padded_params))
    assert out.shape == (BATCH, OUTPUT_SIZE)

    ref_c = reference_forward_compute_dtype(x, params, jnp.bfloat16)
    assert jnp.allclose(out, ref_c, atol=1e-3, rtol=1e-3), \
        "mismatch vs bf16-operand reference"
    ref_f = reference_forward_f32(x, params)
    assert float(jnp.max(jnp.abs(out - ref_f))) < 0.1, "too far from f32 reference"

    # Case 2: ragged batch + multi-step grid with a partial last tile
    # (exercises <=127-row padding, boundary-block masking, and tail slicing).
    BATCH2 = 1100
    x2 = jax.random.normal(jax.random.PRNGKey(1), (BATCH2, INPUT_SIZE), jnp.float32)
    out2 = jax.block_until_ready(
        simple_nn_4hidden(x2, padded_params, tile_batch=1024))
    assert out2.shape == (BATCH2, OUTPUT_SIZE)
    ref2 = reference_forward_compute_dtype(x2, params, jnp.bfloat16)
    assert jnp.allclose(out2, ref2, atol=1e-3, rtol=1e-3), \
        "ragged-batch mismatch vs bf16-operand reference"

    print("KERNEL_OK")
</pallas_src>

<mosaic_0001>
module attributes {stable_mosaic.version = 11 : i64} {
  func.func @_mlp_kernel(%arg0: i32, %arg1: memref<256x16xf32, #tpu.memory_space<vmem>>, %arg2: memref<16x128xbf16, #tpu.memory_space<vmem>>, %arg3: memref<1x128xf32, #tpu.memory_space<vmem>>, %arg4: memref<128x128xbf16, #tpu.memory_space<vmem>>, %arg5: memref<1x128xf32, #tpu.memory_space<vmem>>, %arg6: memref<128x128xbf16, #tpu.memory_space<vmem>>, %arg7: memref<1x128xf32, #tpu.memory_space<vmem>>, %arg8: memref<128x128xbf16, #tpu.memory_space<vmem>>, %arg9: memref<1x128xf32, #tpu.memory_space<vmem>>, %arg10: memref<8x128xbf16, #tpu.memory_space<vmem>>, %arg11: memref<1x128xf32, #tpu.memory_space<vmem>>, %arg12: memref<2x128xf32, #tpu.memory_space<vmem>>) attributes {dimension_semantics = [#tpu.dimension_semantics<parallel>], iteration_bounds = array<i64: 1>, scalar_prefetch = 0 : i64, scratch_operands = 0 : i64, tpu.core_type = #tpu.core_type<tc>, window_params = [{transform_indices = @transform_0, window_bounds = array<i64: 256, 16>}, {pipeline_mode = #tpu.pipeline_mode<synchronous>, transform_indices = @transform_1, window_bounds = array<i64: 16, 128>}, {pipeline_mode = #tpu.pipeline_mode<synchronous>, transform_indices = @transform_2, window_bounds = array<i64: 1, 128>}, {pipeline_mode = #tpu.pipeline_mode<synchronous>, transform_indices = @transform_3, window_bounds = array<i64: 128, 128>}, {pipeline_mode = #tpu.pipeline_mode<synchronous>, transform_indices = @transform_4, window_bounds = array<i64: 1, 128>}, {pipeline_mode = #tpu.pipeline_mode<synchronous>, transform_indices = @transform_5, window_bounds = array<i64: 128, 128>}, {pipeline_mode = #tpu.pipeline_mode<synchronous>, transform_indices = @transform_6, window_bounds = array<i64: 1, 128>}, {pipeline_mode = #tpu.pipeline_mode<synchronous>, transform_indices = @transform_7, window_bounds = array<i64: 128, 128>}, {pipeline_mode = #tpu.pipeline_mode<synchronous>, transform_indices = @transform_8, window_bounds = array<i64: 1, 128>}, {pipeline_mode = #tpu.pipeline_mode<synchronous>, transform_indices = @transform_9, window_bounds = array<i64: 8, 128>}, {pipeline_mode = #tpu.pipeline_mode<synchronous>, transform_indices = @transform_10, window_bounds = array<i64: 1, 128>}, {transform_indices = @transform_11, window_bounds = array<i64: 2, 128>}]} {
    %c0 = arith.constant 0 : index
    %c0_0 = arith.constant 0 : index
    %0 = vector.load %arg1[%c0, %c0_0] : memref<256x16xf32, #tpu.memory_space<vmem>>, vector<256x16xf32>
    %1 = arith.truncf %0 : vector<256x16xf32> to vector<256x16xbf16>
    %c0_1 = arith.constant 0 : index
    %c0_2 = arith.constant 0 : index
    %2 = vector.load %arg2[%c0_1, %c0_2] : memref<16x128xbf16, #tpu.memory_space<vmem>>, vector<16x128xbf16>
    %cst = arith.constant dense<0.000000e+00> : vector<256x128xf32>
    %3 = tpu.matmul %1, %2, %cst {dimension_numbers = #tpu.dot_dimension_numbers<[1], [0], [0], [1], [0, 0, 1, 1], [], []>} : vector<256x16xbf16>, vector<16x128xbf16>, vector<256x128xf32> -> vector<256x128xf32>
    %c0_3 = arith.constant 0 : index
    %c0_4 = arith.constant 0 : index
    %4 = vector.load %arg3[%c0_3, %c0_4] : memref<1x128xf32, #tpu.memory_space<vmem>>, vector<1x128xf32>
    %5 = vector.broadcast %4 : vector<1x128xf32> to vector<256x128xf32>
    %6 = arith.addf %3, %5 : vector<256x128xf32>
    %cst_5 = arith.constant 0.000000e+00 : f32
    %7 = vector.broadcast %cst_5 : f32 to vector<256x128xf32>
    %8 = arith.maximumf %6, %7 : vector<256x128xf32>
    %9 = arith.truncf %8 : vector<256x128xf32> to vector<256x128xbf16>
    %c0_6 = arith.constant 0 : index
    %c0_7 = arith.constant 0 : index
    %10 = vector.load %arg4[%c0_6, %c0_7] : memref<128x128xbf16, #tpu.memory_space<vmem>>, vector<128x128xbf16>
    %cst_8 = arith.constant dense<0.000000e+00> : vector<256x128xf32>
    %11 = tpu.matmul %9, %10, %cst_8 {dimension_numbers = #tpu.dot_dimension_numbers<[1], [0], [0], [1], [0, 0, 1, 1], [], []>} : vector<256x128xbf16>, vector<128x128xbf16>, vector<256x128xf32> -> vector<256x128xf32>
    %c0_9 = arith.constant 0 : index
    %c0_10 = arith.constant 0 : index
    %12 = vector.load %arg5[%c0_9, %c0_10] : memref<1x128xf32, #tpu.memory_space<vmem>>, vector<1x128xf32>
    %13 = vector.broadcast %12 : vector<1x128xf32> to vector<256x128xf32>
    %14 = arith.addf %11, %13 : vector<256x128xf32>
    %cst_11 = arith.constant 0.000000e+00 : f32
    %15 = vector.broadcast %cst_11 : f32 to vector<256x128xf32>
    %16 = arith.maximumf %14, %15 : vector<256x128xf32>
    %17 = arith.truncf %16 : vector<256x128xf32> to vector<256x128xbf16>
    %c0_12 = arith.constant 0 : index
    %c0_13 = arith.constant 0 : index
    %18 = vector.load %arg6[%c0_12, %c0_13] : memref<128x128xbf16, #tpu.memory_space<vmem>>, vector<128x128xbf16>
    %cst_14 = arith.constant dense<0.000000e+00> : vector<256x128xf32>
    %19 = tpu.matmul %17, %18, %cst_14 {dimension_numbers = #tpu.dot_dimension_numbers<[1], [0], [0], [1], [0, 0, 1, 1], [], []>} : vector<256x128xbf16>, vector<128x128xbf16>, vector<256x128xf32> -> vector<256x128xf32>
    %c0_15 = arith.constant 0 : index
    %c0_16 = arith.constant 0 : index
    %20 = vector.load %arg7[%c0_15, %c0_16] : memref<1x128xf32, #tpu.memory_space<vmem>>, vector<1x128xf32>
    %21 = vector.broadcast %20 : vector<1x128xf32> to vector<256x128xf32>
    %22 = arith.addf %19, %21 : vector<256x128xf32>
    %cst_17 = arith.constant 0.000000e+00 : f32
    %23 = vector.broadcast %cst_17 : f32 to vector<256x128xf32>
    %24 = arith.maximumf %22, %23 : vector<256x128xf32>
    %25 = arith.truncf %24 : vector<256x128xf32> to vector<256x128xbf16>
    %c0_18 = arith.constant 0 : index
    %c0_19 = arith.constant 0 : index
    %26 = vector.load %arg8[%c0_18, %c0_19] : memref<128x128xbf16, #tpu.memory_space<vmem>>, vector<128x128xbf16>
    %cst_20 = arith.constant dense<0.000000e+00> : vector<256x128xf32>
    %27 = tpu.matmul %25, %26, %cst_20 {dimension_numbers = #tpu.dot_dimension_numbers<[1], [0], [0], [1], [0, 0, 1, 1], [], []>} : vector<256x128xbf16>, vector<128x128xbf16>, vector<256x128xf32> -> vector<256x128xf32>
    %c0_21 = arith.constant 0 : index
    %c0_22 = arith.constant 0 : index
    %28 = vector.load %arg9[%c0_21, %c0_22] : memref<1x128xf32, #tpu.memory_space<vmem>>, vector<1x128xf32>
    %29 = vector.broadcast %28 : vector<1x128xf32> to vector<256x128xf32>
    %30 = arith.addf %27, %29 : vector<256x128xf32>
    %cst_23 = arith.constant 0.000000e+00 : f32
    %31 = vector.broadcast %cst_23 : f32 to vector<256x128xf32>
    %32 = arith.maximumf %30, %31 : vector<256x128xf32>
    %33 = arith.truncf %32 : vector<256x128xf32> to vector<256x128xbf16>
    %c0_24 = arith.constant 0 : index
    %c0_25 = arith.constant 0 : index
    %34 = vector.load %arg10[%c0_24, %c0_25] : memref<8x128xbf16, #tpu.memory_space<vmem>>, vector<8x128xbf16>
    %c0_26 = arith.constant 0 : index
    %c0_27 = arith.constant 0 : index
    %35 = vector.load %arg11[%c0_26, %c0_27] : memref<1x128xf32, #tpu.memory_space<vmem>>, vector<1x128xf32>
    %36 = vector.extract_strided_slice %33 {offsets = [0, 0], sizes = [128, 128], strides = [1, 1]} : vector<256x128xbf16> to vector<128x128xbf16>
    "tpu.trace_start"() <{level = 10 : i32, message = "od,bd->ob"}> : () -> ()
    %cst_28 = arith.constant dense<0.000000e+00> : vector<8x128xf32>
    %37 = tpu.matmul %34, %36, %cst_28 {dimension_numbers = #tpu.dot_dimension_numbers<[1], [1], [0], [0], [0, 0, 1, 0], [], []>} : vector<8x128xbf16>, vector<128x128xbf16>, vector<8x128xf32> -> vector<8x128xf32>
    "tpu.trace_stop"() : () -> ()
    %38 = vector.extract_strided_slice %37 {offsets = [0, 0], sizes = [1, 128], strides = [1, 1]} : vector<8x128xf32> to vector<1x128xf32>
    %39 = arith.addf %38, %35 : vector<1x128xf32>
    %c0_29 = arith.constant 0 : index
    %c0_30 = arith.constant 0 : index
    %40 = vector.load %arg12[%c0_29, %c0_30] : memref<2x128xf32, #tpu.memory_space<vmem>>, vector<1x128xf32>
    tpu.vector_store %arg12[%c0_29, %c0_30], %39 {strides = array<i32>} : memref<2x128xf32, #tpu.memory_space<vmem>>, vector<1x128xf32>,
    %41 = vector.extract_strided_slice %33 {offsets = [128, 0], sizes = [128, 128], strides = [1, 1]} : vector<256x128xbf16> to vector<128x128xbf16>
    "tpu.trace_start"() <{level = 10 : i32, message = "od,bd->ob"}> : () -> ()
    %cst_31 = arith.constant dense<0.000000e+00> : vector<8x128xf32>
    %42 = tpu.matmul %34, %41, %cst_31 {dimension_numbers = #tpu.dot_dimension_numbers<[1], [1], [0], [0], [0, 0, 1, 0], [], []>} : vector<8x128xbf16>, vector<128x128xbf16>, vector<8x128xf32> -> vector<8x128xf32>
    "tpu.trace_stop"() : () -> ()
    %43 = vector.extract_strided_slice %42 {offsets = [0, 0], sizes = [1, 128], strides = [1, 1]} : vector<8x128xf32> to vector<1x128xf32>
    %44 = arith.addf %43, %35 : vector<1x128xf32>
    %c1 = arith.constant 1 : index
    %c0_32 = arith.constant 0 : index
    %45 = vector.load %arg12[%c1, %c0_32] : memref<2x128xf32, #tpu.memory_space<vmem>>, vector<1x128xf32>
    tpu.vector_store %arg12[%c1, %c0_32], %44 {strides = array<i32>} : memref<2x128xf32, #tpu.memory_space<vmem>>, vector<1x128xf32>,
    return
  }
  func.func @transform_0(%arg0: i32) -> (i32, i32) {
    %c0_i32 = arith.constant 0 : i32
    %c0_i32_0 = arith.constant 0 : i32
    return %arg0, %c0_i32 : i32, i32
  }
  func.func @transform_1(%arg0: i32) -> (i32, i32) {
    %c0_i32 = arith.constant 0 : i32
    %c0_i32_0 = arith.constant 0 : i32
    %c0_i32_1 = arith.constant 0 : i32
    return %c0_i32, %c0_i32_0 : i32, i32
  }
  func.func @transform_2(%arg0: i32) -> (i32, i32) {
    %c0_i32 = arith.constant 0 : i32
    %c0_i32_0 = arith.constant 0 : i32
    %c0_i32_1 = arith.constant 0 : i32
    return %c0_i32, %c0_i32_0 : i32, i32
  }
  func.func @transform_3(%arg0: i32) -> (i32, i32) {
    %c0_i32 = arith.constant 0 : i32
    %c0_i32_0 = arith.constant 0 : i32
    %c0_i32_1 = arith.constant 0 : i32
    return %c0_i32, %c0_i32_0 : i32, i32
  }
  func.func @transform_4(%arg0: i32) -> (i32, i32) {
    %c0_i32 = arith.constant 0 : i32
    %c0_i32_0 = arith.constant 0 : i32
    %c0_i32_1 = arith.constant 0 : i32
    return %c0_i32, %c0_i32_0 : i32, i32
  }
  func.func @transform_5(%arg0: i32) -> (i32, i32) {
    %c0_i32 = arith.constant 0 : i32
    %c0_i32_0 = arith.constant 0 : i32
    %c0_i32_1 = arith.constant 0 : i32
    return %c0_i32, %c0_i32_0 : i32, i32
  }
  func.func @transform_6(%arg0: i32) -> (i32, i32) {
    %c0_i32 = arith.constant 0 : i32
    %c0_i32_0 = arith.constant 0 : i32
    %c0_i32_1 = arith.constant 0 : i32
    return %c0_i32, %c0_i32_0 : i32, i32
  }
  func.func @transform_7(%arg0: i32) -> (i32, i32) {
    %c0_i32 = arith.constant 0 : i32
    %c0_i32_0 = arith.constant 0 : i32
    %c0_i32_1 = arith.constant 0 : i32
    return %c0_i32, %c0_i32_0 : i32, i32
  }
  func.func @transform_8(%arg0: i32) -> (i32, i32) {
    %c0_i32 = arith.constant 0 : i32
    %c0_i32_0 = arith.constant 0 : i32
    %c0_i32_1 = arith.constant 0 : i32
    return %c0_i32, %c0_i32_0 : i32, i32
  }
  func.func @transform_9(%arg0: i32) -> (i32, i32) {
    %c0_i32 = arith.constant 0 : i32
    %c0_i32_0 = arith.constant 0 : i32
    %c0_i32_1 = arith.constant 0 : i32
    return %c0_i32, %c0_i32_0 : i32, i32
  }
  func.func @transform_10(%arg0: i32) -> (i32, i32) {
    %c0_i32 = arith.constant 0 : i32
    %c0_i32_0 = arith.constant 0 : i32
    %c0_i32_1 = arith.constant 0 : i32
    return %c0_i32, %c0_i32_0 : i32, i32
  }
  func.func @transform_11(%arg0: i32) -> (i32, i32) {
    %c0_i32 = arith.constant 0 : i32
    %c0_i32_0 = arith.constant 0 : i32
    return %arg0, %c0_i32 : i32, i32
  }
}

</mosaic_0001>

<bundles_post_ra>
// kernel: tpu_custom_call.1
= control target key start
LH: loop header
LB: loop body
LE: loop exit
PB: predicated region body
PF: predicated region fallthrough
CT: control target
= control target key end

     0   :  { %vm103_vm0 = vcmask 130048   ;;  %s2160_s0 = inlined_call_operand.vmem [shape: f32[256,16], index: 0, kind: input, shape index: {}]   ;;  %s2161_s1 = inlined_call_operand.vmem [shape: bf16[16,128], index: 1, kind: input, shape index: {}]   ;;  %s2162_s2 = inlined_call_operand.vmem [shape: f32[1,128], index: 2, kind: input, shape index: {}]   ;;  %s2163_s3 = inlined_call_operand.vmem [shape: bf16[128,128], index: 3, kind: input, shape index: {}]   ;;  %s2164_s4 = inlined_call_operand.vmem [shape: f32[1,128], index: 4, kind: input, shape index: {}]   ;;  %s2165_s5 = inlined_call_operand.vmem [shape: bf16[128,128], index: 5, kind: input, shape index: {}]   ;;  %s2166_s6 = inlined_call_operand.vmem [shape: f32[1,128], index: 6, kind: input, shape index: {}]   ;;  %s2167_s7 = inlined_call_operand.vmem [shape: bf16[128,128], index: 7, kind: input, shape index: {}]   ;;  %s2168_s8 = inlined_call_operand.vmem [shape: f32[1,128], index: 8, kind: input, shape index: {}]   ;;  %s2169_s9 = inlined_call_operand.vmem [shape: bf16[8,128], index: 9, kind: input, shape index: {}]   ;;  %s2170_s10 = inlined_call_operand.vmem [shape: f32[1,128], index: 10, kind: input, shape index: {}]   ;;  %s2171_s11 = inlined_call_operand.hbm [shape: f32[2,128], index: 11, kind: output, shape index: {}]  }
   0x1   :  { %v1674_v0 = vld [vmem:[%s2161_s1] sm:$0xff]   ;;  %v41_v2 = vld [vmem:[%s2160_s0 + $0x8] sm:$0xff]  ;;  %v42_v3 = vld [vmem:[%s2160_s0 + $0x10] sm:$0xff] }
   0x2   :  { %v40_v1 = vld [vmem:[%s2160_s0] sm:$0xff]  ;;  %1453 = vmatprep.subr.bf16.mxu0 %v1674_v0  ;;  %v43_v5 = vld [vmem:[%s2160_s0 + $0x18] sm:$0xff]  ;;  %v45_v7 = vld [vmem:[%s2160_s0 + $0x28] sm:$0xff] }
   0x3   :  { %v72_v4 = vpack.c.bf16 %v41_v2, %v40_v1  ;;  %v44_v6 = vld [vmem:[%s2160_s0 + $0x20] sm:$0xff]  ;;  %1454 = vmatpush3.bf16.msra.mxu0 %v1674_v0  ;;  %v73_v8 = vpack.c.bf16 %v43_v5, %v42_v3  ;;  %v46_v10 = vld [vmem:[%s2160_s0 + $0x30] sm:$0xff]  ;;  %v47_v11 = vld [vmem:[%s2160_s0 + $0x38] sm:$0xff] }
   0x4   :  { %v74_v9 = vpack.c.bf16 %v45_v7, %v44_v6  ;;  %v48_v12 = vld [vmem:[%s2160_s0 + $0x40] sm:$0xff]  ;;  %v49_v13 = vld [vmem:[%s2160_s0 + $0x48] sm:$0xff]  ;;  %v75_v14 = vpack.c.bf16 %v47_v11, %v46_v10  ;;  %v50_v17 = vld [vmem:[%s2160_s0 + $0x50] sm:$0xff] }
   0x5   :  { %1455 = vmatprep.mubr.msk.bf16.mxu0 %vm103_vm0, %v72_v4  ;;  %v76_v15 = vpack.c.bf16 %v49_v13, %v48_v12  ;;  %v1675_v16 = vld [vmem:[%s2163_s3] sm:$0xff]   ;;  %v51_v18 = vld [vmem:[%s2160_s0 + $0x58] sm:$0xff]  ;;  %v1676_v19 = vld [vmem:[%s2163_s3 + $0x8] sm:$0xff]  }
   0x6   :  { %1456 = vmatmul.mubr.msk.bf16.vlgmr.msra.gmra.mrb[0].mxu0 %vm103_vm0, %v73_v8  ;;  %v52_v20 = vld [vmem:[%s2160_s0 + $0x60] sm:$0xff]  ;;  %1487 = vmatprep.subr.bf16.mxu1 %v1675_v16  ;;  %v53_v21 = vld [vmem:[%s2160_s0 + $0x68] sm:$0xff]  ;;  %v1677_v22 = vld [vmem:[%s2163_s3 + $0x10] sm:$0xff]   ;;  %v77_v23 = vpack.c.bf16 %v51_v18, %v50_v17 }
   0x7   :  { %1459 = vmatprep.mubr.msk.bf16.mxu0 %vm103_vm0, %v74_v9  ;;  %1488 = vmatpush3.bf16.msra.mxu1 %v1675_v16  ;;  %v1678_v24 = vld [vmem:[%s2163_s3 + $0x18] sm:$0xff]   ;;  %v78_v25 = vpack.c.bf16 %v53_v21, %v52_v20  ;;  %v54_v26 = vld [vmem:[%s2160_s0 + $0x70] sm:$0xff]  ;;  %v56_v28 = vld [vmem:[%s2160_s0 + $0x80] sm:$0xff] }
   0x8   :  { %1489 = vmatprep.subr.bf16.mxu1 %v1676_v19  ;;  %v55_v27 = vld [vmem:[%s2160_s0 + $0x78] sm:$0xff]  ;;  %v57_v29 = vld [vmem:[%s2160_s0 + $0x88] sm:$0xff]  ;;  %v1679_v30 = vld [vmem:[%s2163_s3 + $0x20] sm:$0xff]  }
   0x9   :  { %v79_v31 = vpack.c.bf16 %v55_v27, %v54_v26  ;;  %v1680_v32 = vld [vmem:[%s2163_s3 + $0x28] sm:$0xff]   ;;  %v80_v33 = vpack.c.bf16 %v57_v29, %v56_v28 }
   0xb   :  { %1490 = vmatpush3.bf16.msra.mxu1 %v1676_v19 }
   0xc   :  { %1491 = vmatprep.subr.bf16.mxu1 %v1677_v22 }
   0xe   :  { %1460 = vmatmul.mubr.msk.bf16.gmra.mrb[4].mxu0 %vm103_vm0, %v75_v14 }
   0xf   :  { %1463 = vmatprep.mubr.msk.bf16.mxu0 %vm103_vm0, %v76_v15  ;;  %1492 = vmatpush3.bf16.msra.mxu1 %v1677_v22 }
  0x10   :  { %1493 = vmatprep.subr.bf16.mxu1 %v1678_v24 }
  0x13   :  { %1494 = vmatpush3.bf16.msra.mxu1 %v1678_v24 }
  0x14   :  { %1495 = vmatprep.subr.bf16.mxu1 %v1679_v30 }
  0x16   :  { %1464 = vmatmul.mubr.msk.bf16.gmra.mrb[8].mxu0 %vm103_vm0, %v77_v23 }
  0x17   :  { %1467 = vmatprep.mubr.msk.bf16.mxu0 %vm103_vm0, %v78_v25 }
  0x18   :  { %16 = vsyncpa [#allocation3], 0  ;;  %v58_v34 = vld [vmem:[%s2160_s0 + $0x90] sm:$0xff]  ;;  %v59_v35 = vld [vmem:[%s2160_s0 + $0x98] sm:$0xff]  ;;  %1496 = vmatpush3.bf16.msra.mxu1 %v1679_v30  ;;  %vm1724_vm1 = vmmov 0  }
  0x19   :  { %v60_v36 = vld [vmem:[%s2160_s0 + $0xa0] sm:$0xff]  ;;  %v61_v37 = vld [vmem:[%s2160_s0 + $0xa8] sm:$0xff]  ;;  %1497 = vmatprep.subr.bf16.mxu1 %v1680_v32  ;;  %v81_v38 = vpack.c.bf16 %v59_v35, %v58_v34  ;;  %v62_v40 = vld [vmem:[%s2160_s0 + $0xb0] sm:$0xff] }
  0x1a   :  { %v82_v39 = vpack.c.bf16 %v61_v37, %v60_v36  ;;  %v63_v41 = vld [vmem:[%s2160_s0 + $0xb8] sm:$0xff]  ;;  %v64_v42 = vld [vmem:[%s2160_s0 + $0xc0] sm:$0xff]  ;;  %v65_v43 = vld [vmem:[%s2160_s0 + $0xc8] sm:$0xff] }
  0x1b   :  { %v83_v44 = vpack.c.bf16 %v63_v41, %v62_v40  ;;  %v84_v45 = vpack.c.bf16 %v65_v43, %v64_v42  ;;  %v66_v46 = vld [vmem:[%s2160_s0 + $0xd0] sm:$0xff]  ;;  %v67_v47 = vld [vmem:[%s2160_s0 + $0xd8] sm:$0xff]  ;;  %v68_v48 = vld [vmem:[%s2160_s0 + $0xe0] sm:$0xff] }
  0x1c   :  { %1498 = vmatpush3.bf16.msra.mxu1 %v1680_v32  ;;  %v69_v49 = vld [vmem:[%s2160_s0 + $0xe8] sm:$0xff]  ;;  %v85_v50 = vpack.c.bf16 %v67_v47, %v66_v46  ;;  %v70_v52 = vld [vmem:[%s2160_s0 + $0xf0] sm:$0xff]  ;;  %v71_v53 = vld [vmem:[%s2160_s0 + $0xf8] sm:$0xff] }
  0x1d   :  { %v86_v51 = vpack.c.bf16 %v69_v49, %v68_v48  ;;  %v87_v54 = vpack.c.bf16 %v71_v53, %v70_v52  ;;  %v1681_v55 = vld [vmem:[%s2163_s3 + $0x30] sm:$0xff]   ;;  %v1682_v56 = vld [vmem:[%s2163_s3 + $0x38] sm:$0xff]   ;;  %v1683_v57 = vld [vmem:[%s2165_s5] sm:$0xff]  }
  0x1e   :  { %1468 = vmatmul.mubr.msk.bf16.gmra.mrb[12].mxu0 %vm103_vm0, %v79_v31  ;;  %1499 = vmatprep.subr.bf16.mxu1 %v1681_v55  ;;  %v1684_v58 = vld [vmem:[%s2165_s5 + $0x8] sm:$0xff]   ;;  %v1685_v59 = vld [vmem:[%s2165_s5 + $0x10] sm:$0xff]   ;;  %v1686_v60 = vld [vmem:[%s2165_s5 + $0x18] sm:$0xff]  }
  0x1f   :  { %1471 = vmatprep.mubr.msk.bf16.mxu0 %vm103_vm0, %v80_v33  ;;  %1535 = vmatprep.subr.bf16.mxu0 %v1683_v57  ;;  %v1687_v61 = vld [vmem:[%s2165_s5 + $0x20] sm:$0xff]   ;;  %v1688_v62 = vld [vmem:[%s2165_s5 + $0x28] sm:$0xff]   ;;  %v1689_v63 = vld [vmem:[%s2165_s5 + $0x30] sm:$0xff]  }
  0x20   :  { %1500 = vmatpush3.bf16.msra.mxu1 %v1681_v55  ;;  %1536 = vmatpush3.bf16.msra.mxu0 %v1683_v57  ;;  %v1949_v0 = vld [vmem:[%s2162_s2] ss:$0 sm:$0xff] }
  0x21   :  { %1501 = vmatprep.subr.bf16.mxu1 %v1682_v56  ;;  %1537 = vmatprep.subr.bf16.mxu0 %v1684_v58 }
  0x24   :  { %1502 = vmatpush3.bf16.msra.mxu1 %v1682_v56  ;;  %1538 = vmatpush3.bf16.msra.mxu0 %v1684_v58 }
  0x25   :  { %1539 = vmatprep.subr.bf16.mxu0 %v1685_v59 }
  0x26   :  { %1472 = vmatmul.mubr.msk.bf16.gmra.mrb[16].mxu0 %vm103_vm0, %v81_v38 }
  0x27   :  { %1475 = vmatprep.mubr.msk.bf16.mxu0 %vm103_vm0, %v82_v39 }
  0x28   :  { %1540 = vmatpush3.bf16.msra.mxu0 %v1685_v59 }
  0x29   :  { %1541 = vmatprep.subr.bf16.mxu0 %v1686_v60 }
  0x2c   :  { %1542 = vmatpush3.bf16.msra.mxu0 %v1686_v60 }
  0x2d   :  { %1543 = vmatprep.subr.bf16.mxu0 %v1687_v61 }
  0x2e   :  { %1476 = vmatmul.mubr.msk.bf16.gmra.mrb[20].mxu0 %vm103_vm0, %v83_v44 }
  0x2f   :  { %1479 = vmatprep.mubr.msk.bf16.mxu0 %vm103_vm0, %v84_v45 }
  0x30   :  { %1544 = vmatpush3.bf16.msra.mxu0 %v1687_v61 }
  0x31   :  { %1545 = vmatprep.subr.bf16.mxu0 %v1688_v62 }
  0x34   :  { %1546 = vmatpush3.bf16.msra.mxu0 %v1688_v62 }
  0x35   :  { %1547 = vmatprep.subr.bf16.mxu0 %v1689_v63 }
  0x36   :  { %1480 = vmatmul.mubr.msk.bf16.gmra.mrb[24].mxu0 %vm103_vm0, %v85_v50 }
  0x37   :  { %1483 = vmatprep.mubr.msk.bf16.mxu0 %vm103_vm0, %v86_v51 }
  0x38   :  { %1548 = vmatpush3.bf16.msra.mxu0 %v1689_v63 }
  0x3e   :  { %1484 = vmatmul.mubr.msk.bf16.gmra.mrb[28].mxu0 %vm103_vm0, %v87_v54 }
  0xd9   :  { %v1457_v1 = vpop.f32.mrb[0].mxu0 }
  0xda   :  { %v195_v2 = vadd.f32 %v1457_v1, %v1949_v0  ;;  %v186_v3 = vpop.f32.mrb[1].mxu0 }
  0xdb   :  { %v187_v4 = vadd.f32 %v1949_v0, %v186_v3  ;;  %v1458_v5 = vpop.f32.mrb[2].mxu0 }
  0xdc   :  { %v198_v6 = vadd.f32 %v1458_v5, %v1949_v0  ;;  %v189_v7 = vpop.f32.mrb[3].mxu0  ;;  %v315_v9 = vmax.f32 %v195_v2, 0.0 }
  0xdd   :  { %v190_v8 = vadd.f32 %v1949_v0, %v189_v7  ;;  %v313_v11 = vmax.f32 %v187_v4, 0.0 }
  0xde   :  { %v316_v10 = vmax.f32 %v198_v6, 0.0 }
  0xdf   :  { %v314_v12 = vmax.f32 %v190_v8, 0.0 }
  0xe0   :  { %v346_v13 = vpack.c.bf16 %v316_v10, %v315_v9 }
  0xe1   :  { %v1461_v14 = vpop.f32.mrb[4].mxu0  ;;  %v345_v15 = vpack.c.bf16 %v314_v12, %v313_v11 }
  0xe2   :  { %v211_v16 = vadd.f32 %v1461_v14, %v1949_v0  ;;  %v202_v17 = vpop.f32.mrb[5].mxu0 }
  0xe3   :  { %v203_v18 = vadd.f32 %v1949_v0, %v202_v17  ;;  %v1462_v19 = vpop.f32.mrb[6].mxu0  ;;  %1503 = vmatprep.mubr.bf16.mxu1 %v345_v15 }
  0xe4   :  { %v214_v20 = vadd.f32 %v1462_v19, %v1949_v0  ;;  %v205_v21 = vpop.f32.mrb[7].mxu0  ;;  %1504 = vmatmul.mubr.bf16.vlgmr.msra.gmra.mrb[0].mxu1 %v346_v13  ;;  %v319_v23 = vmax.f32 %v211_v16, 0.0 }
  0xe5   :  { %v206_v22 = vadd.f32 %v1949_v0, %v205_v21  ;;  %v317_v25 = vmax.f32 %v203_v18, 0.0 }
  0xe6   :  { %v320_v24 = vmax.f32 %v214_v20, 0.0 }
  0xe7   :  { %v318_v26 = vmax.f32 %v206_v22, 0.0 }
  0xe8   :  { %v348_v27 = vpack.c.bf16 %v320_v24, %v319_v23 }
  0xe9   :  { %v347_v28 = vpack.c.bf16 %v318_v26, %v317_v25  ;;  %v1465_v29 = vpop.f32.mrb[8].mxu0 }
  0xea   :  { %v227_v30 = vadd.f32 %v1465_v29, %v1949_v0  ;;  %v218_v31 = vpop.f32.mrb[9].mxu0 }
  0xeb   :  { %v219_v32 = vadd.f32 %v1949_v0, %v218_v31  ;;  %v1466_v33 = vpop.f32.mrb[10].mxu0  ;;  %1507 = vmatprep.mubr.bf16.mxu1 %v347_v28 }
  0xec   :  { %v230_v34 = vadd.f32 %v1466_v33, %v1949_v0  ;;  %v221_v35 = vpop.f32.mrb[11].mxu0  ;;  %1508 = vmatmul.mubr.bf16.gmra.mrb[4].mxu1 %v348_v27  ;;  %v323_v37 = vmax.f32 %v227_v30, 0.0 }
  0xed   :  { %v222_v36 = vadd.f32 %v1949_v0, %v221_v35  ;;  %v321_v39 = vmax.f32 %v219_v32, 0.0 }
  0xee   :  { %v324_v38 = vmax.f32 %v230_v34, 0.0 }
  0xef   :  { %v322_v40 = vmax.f32 %v222_v36, 0.0 }
  0xf0   :  { %v350_v41 = vpack.c.bf16 %v324_v38, %v323_v37 }
  0xf1   :  { %v349_v42 = vpack.c.bf16 %v322_v40, %v321_v39  ;;  %v1469_v43 = vpop.f32.mrb[12].mxu0 }
  0xf2   :  { %v243_v44 = vadd.f32 %v1469_v43, %v1949_v0  ;;  %v234_v45 = vpop.f32.mrb[13].mxu0 }
  0xf3   :  { %v235_v46 = vadd.f32 %v1949_v0, %v234_v45  ;;  %v1470_v47 = vpop.f32.mrb[14].mxu0  ;;  %1511 = vmatprep.mubr.bf16.mxu1 %v349_v42 }
  0xf4   :  { %v246_v48 = vadd.f32 %v1470_v47, %v1949_v0  ;;  %v237_v49 = vpop.f32.mrb[15].mxu0  ;;  %1512 = vmatmul.mubr.bf16.gmra.mrb[8].mxu1 %v350_v41  ;;  %v327_v51 = vmax.f32 %v243_v44, 0.0 }
  0xf5   :  { %v238_v50 = vadd.f32 %v1949_v0, %v237_v49  ;;  %v325_v53 = vmax.f32 %v235_v46, 0.0 }
  0xf6   :  { %v328_v52 = vmax.f32 %v246_v48, 0.0 }
  0xf7   :  { %v326_v54 = vmax.f32 %v238_v50, 0.0  ;;  %v1690_v50 = vld [vmem:[%s2165_s5 + $0x38] sm:$0xff]  }
  0xf8   :  { %v352_v55 = vpack.c.bf16 %v328_v52, %v327_v51  ;;  %1549 = vmatprep.subr.bf16.mxu0 %v1690_v50  ;;  %v1691_v51 = vld [vmem:[%s2167_s7] sm:$0xff]   ;;  %v1693_v52 = vld [vmem:[%s2167_s7 + $0x10] sm:$0xff]  }
  0xf9   :  { %v351_v56 = vpack.c.bf16 %v326_v54, %v325_v53  ;;  %v1473_v57 = vpop.f32.mrb[16].mxu0  ;;  %1550 = vmatpush3.bf16.msra.mxu0 %v1690_v50  ;;  %1583 = vmatprep.subr.bf16.mxu1 %v1691_v51  ;;  %v1694_v53 = vld [vmem:[%s2167_s7 + $0x18] sm:$0xff]   ;;  %v1695_v54 = vld [vmem:[%s2167_s7 + $0x20] sm:$0xff]  }
  0xfa   :  { %v259_v58 = vadd.f32 %v1473_v57, %v1949_v0  ;;  %v250_v59 = vpop.f32.mrb[17].mxu0  ;;  %1584 = vmatpush3.bf16.msra.mxu1 %v1691_v51  ;;  %v2010_v57 = vld [vmem:[%s2164_s4] ss:$0 sm:$0xff] }
  0xfb   :  { %v251_v60 = vadd.f32 %v1949_v0, %v250_v59  ;;  %v1474_v61 = vpop.f32.mrb[18].mxu0  ;;  %1515 = vmatprep.mubr.bf16.mxu1 %v351_v56  ;;  %v1697_v56 = vld [vmem:[%s2167_s7 + $0x30] sm:$0xff]  }
  0xfc   :  { %v262_v62 = vadd.f32 %v1474_v61, %v1949_v0  ;;  %v253_v63 = vpop.f32.mrb[19].mxu0  ;;  %1516 = vmatmul.mubr.bf16.gmra.mrb[12].mxu1 %v352_v55  ;;  %v331_v2 = vmax.f32 %v259_v58, 0.0  ;;  %v1696_v55 = vld [vmem:[%s2167_s7 + $0x28] sm:$0xff]  }
  0xfd   :  { %v254_v1 = vadd.f32 %v1949_v0, %v253_v63  ;;  %v329_v4 = vmax.f32 %v251_v60, 0.0 }
  0xfe   :  { %v332_v3 = vmax.f32 %v262_v62, 0.0 }
  0xff   :  { %v330_v5 = vmax.f32 %v254_v1, 0.0 }
 0x100   :  { %v354_v6 = vpack.c.bf16 %v332_v3, %v331_v2 }
 0x101   :  { %v353_v7 = vpack.c.bf16 %v330_v5, %v329_v4  ;;  %v1477_v8 = vpop.f32.mrb[20].mxu0 }
 0x102   :  { %v275_v9 = vadd.f32 %v1477_v8, %v1949_v0  ;;  %v266_v10 = vpop.f32.mrb[21].mxu0 }
 0x103   :  { %v267_v11 = vadd.f32 %v1949_v0, %v266_v10  ;;  %v1478_v12 = vpop.f32.mrb[22].mxu0  ;;  %1519 = vmatprep.mubr.bf16.mxu1 %v353_v7 }
 0x104   :  { %v335_v13 = vmax.f32 %v275_v9, 0.0  ;;  %v278_v14 = vadd.f32 %v1478_v12, %v1949_v0  ;;  %v269_v15 = vpop.f32.mrb[23].mxu0  ;;  %1520 = vmatmul.mubr.bf16.gmra.mrb[16].mxu1 %v354_v6 }
 0x105   :  { %v333_v16 = vmax.f32 %v267_v11, 0.0  ;;  %v270_v17 = vadd.f32 %v1949_v0, %v269_v15 }
 0x106   :  { %v336_v18 = vmax.f32 %v278_v14, 0.0 }
 0x107   :  { %v334_v19 = vmax.f32 %v270_v17, 0.0 }
 0x108   :  { %v356_v20 = vpack.c.bf16 %v336_v18, %v335_v13 }
 0x109   :  { %v355_v21 = vpack.c.bf16 %v334_v19, %v333_v16  ;;  %v1481_v22 = vpop.f32.mrb[24].mxu0 }
 0x10a   :  { %v291_v23 = vadd.f32 %v1481_v22, %v1949_v0  ;;  %v282_v24 = vpop.f32.mrb[25].mxu0 }
 0x10b   :  { %v283_v25 = vadd.f32 %v1949_v0, %v282_v24  ;;  %1523 = vmatprep.mubr.bf16.mxu1 %v355_v21  ;;  %v1482_v26 = vpop.f32.mrb[26].mxu0 }
 0x10c   :  { %v339_v27 = vmax.f32 %v291_v23, 0.0  ;;  %v294_v28 = vadd.f32 %v1482_v26, %v1949_v0  ;;  %1524 = vmatmul.mubr.bf16.gmra.mrb[20].mxu1 %v356_v20  ;;  %v285_v29 = vpop.f32.mrb[27].mxu0 }
 0x10d   :  { %v337_v30 = vmax.f32 %v283_v25, 0.0  ;;  %v286_v31 = vadd.f32 %v1949_v0, %v285_v29 }
 0x10e   :  { %v340_v32 = vmax.f32 %v294_v28, 0.0 }
 0x10f   :  { %v338_v33 = vmax.f32 %v286_v31, 0.0 }
 0x110   :  { %v358_v34 = vpack.c.bf16 %v340_v32, %v339_v27 }
 0x111   :  { %v357_v35 = vpack.c.bf16 %v338_v33, %v337_v30  ;;  %v1485_v36 = vpop.f32.mrb[28].mxu0 }
 0x112   :  { %v307_v37 = vadd.f32 %v1485_v36, %v1949_v0  ;;  %v298_v38 = vpop.f32.mrb[29].mxu0 }
 0x113   :  { %1527 = vmatprep.mubr.bf16.mxu1 %v357_v35  ;;  %v299_v39 = vadd.f32 %v1949_v0, %v298_v38  ;;  %v1486_v40 = vpop.f32.mrb[30].mxu0 }
 0x114   :  { %1528 = vmatmul.mubr.bf16.gmra.mrb[24].mxu1 %v358_v34  ;;  %v343_v41 = vmax.f32 %v307_v37, 0.0  ;;  %v310_v42 = vadd.f32 %v1486_v40, %v1949_v0  ;;  %v301_v43 = vpop.f32.mrb[31].mxu0 }
 0x115   :  { %v341_v44 = vmax.f32 %v299_v39, 0.0  ;;  %v302_v45 = vadd.f32 %v1949_v0, %v301_v43  ;;  %v1692_v0 = vld [vmem:[%s2167_s7 + $0x8] sm:$0xff]  }
 0x116   :  { %v344_v46 = vmax.f32 %v310_v42, 0.0  ;;  %1585 = vmatprep.subr.bf16.mxu1 %v1692_v0 }
 0x117   :  { %v342_v47 = vmax.f32 %v302_v45, 0.0  ;;  %1586 = vmatpush3.bf16.msra.mxu1 %v1692_v0 }
 0x118   :  { %v360_v48 = vpack.c.bf16 %v344_v46, %v343_v41  ;;  %1587 = vmatprep.subr.bf16.mxu1 %v1693_v52 }
 0x119   :  { %v359_v49 = vpack.c.bf16 %v342_v47, %v341_v44 }
 0x11b   :  { %1531 = vmatprep.mubr.bf16.mxu1 %v359_v49  ;;  %1588 = vmatpush3.bf16.msra.mxu1 %v1693_v52 }
 0x11c   :  { %1532 = vmatmul.mubr.bf16.gmra.mrb[28].mxu1 %v360_v48  ;;  %1589 = vmatprep.subr.bf16.mxu1 %v1694_v53 }
 0x11f   :  { %1590 = vmatpush3.bf16.msra.mxu1 %v1694_v53 }
 0x120   :  { %1591 = vmatprep.subr.bf16.mxu1 %v1695_v54 }
 0x123   :  { %1592 = vmatpush3.bf16.msra.mxu1 %v1695_v54 }
 0x124   :  { %1593 = vmatprep.subr.bf16.mxu1 %v1696_v55 }
 0x127   :  { %1594 = vmatpush3.bf16.msra.mxu1 %v1696_v55 }
 0x128   :  { %1595 = vmatprep.subr.bf16.mxu1 %v1697_v56 }
 0x12b   :  { %1596 = vmatpush3.bf16.msra.mxu1 %v1697_v56 }
 0x1b7   :  { %v1505_v58 = vpop.f32.mrb[0].mxu1 }
 0x1b8   :  { %v475_v59 = vadd.f32 %v1505_v58, %v2010_v57  ;;  %v466_v60 = vpop.f32.mrb[1].mxu1 }
 0x1b9   :  { %v467_v61 = vadd.f32 %v2010_v57, %v466_v60  ;;  %v1506_v62 = vpop.f32.mrb[2].mxu1 }
 0x1ba   :  { %v478_v63 = vadd.f32 %v1506_v62, %v2010_v57  ;;  %v469_v1 = vpop.f32.mrb[3].mxu1  ;;  %v595_v3 = vmax.f32 %v475_v59, 0.0 }
 0x1bb   :  { %v470_v2 = vadd.f32 %v2010_v57, %v469_v1  ;;  %v593_v5 = vmax.f32 %v467_v61, 0.0 }
 0x1bc   :  { %v596_v4 = vmax.f32 %v478_v63, 0.0 }
 0x1bd   :  { %v594_v6 = vmax.f32 %v470_v2, 0.0 }
 0x1be   :  { %v626_v7 = vpack.c.bf16 %v596_v4, %v595_v3 }
 0x1bf   :  { %v625_v8 = vpack.c.bf16 %v594_v6, %v593_v5  ;;  %v1509_v9 = vpop.f32.mrb[4].mxu1 }
 0x1c0   :  { %v491_v10 = vadd.f32 %v1509_v9, %v2010_v57  ;;  %v482_v11 = vpop.f32.mrb[5].mxu1 }
 0x1c1   :  { %v483_v12 = vadd.f32 %v2010_v57, %v482_v11  ;;  %v1510_v13 = vpop.f32.mrb[6].mxu1  ;;  %1551 = vmatprep.mubr.bf16.mxu0 %v625_v8 }
 0x1c2   :  { %v494_v14 = vadd.f32 %v1510_v13, %v2010_v57  ;;  %v485_v15 = vpop.f32.mrb[7].mxu1  ;;  %1552 = vmatmul.mubr.bf16.vlgmr.msra.gmra.mrb[32].mxu0 %v626_v7  ;;  %v599_v17 = vmax.f32 %v491_v10, 0.0 }
 0x1c3   :  { %v486_v16 = vadd.f32 %v2010_v57, %v485_v15  ;;  %v597_v19 = vmax.f32 %v483_v12, 0.0 }
 0x1c4   :  { %v600_v18 = vmax.f32 %v494_v14, 0.0 }
 0x1c5   :  { %v598_v20 = vmax.f32 %v486_v16, 0.0 }
 0x1c6   :  { %v628_v21 = vpack.c.bf16 %v600_v18, %v599_v17 }
 0x1c7   :  { %v627_v22 = vpack.c.bf16 %v598_v20, %v597_v19  ;;  %v1513_v23 = vpop.f32.mrb[8].mxu1 }
 0x1c8   :  { %v507_v24 = vadd.f32 %v1513_v23, %v2010_v57  ;;  %v498_v25 = vpop.f32.mrb[9].mxu1 }
 0x1c9   :  { %v499_v26 = vadd.f32 %v2010_v57, %v498_v25  ;;  %v1514_v27 = vpop.f32.mrb[10].mxu1  ;;  %1555 = vmatprep.mubr.bf16.mxu0 %v627_v22 }
 0x1ca   :  { %v510_v28 = vadd.f32 %v1514_v27, %v2010_v57  ;;  %v501_v29 = vpop.f32.mrb[11].mxu1  ;;  %1556 = vmatmul.mubr.bf16.gmra.mrb[36].mxu0 %v628_v21  ;;  %v603_v31 = vmax.f32 %v507_v24, 0.0 }
 0x1cb   :  { %v502_v30 = vadd.f32 %v2010_v57, %v501_v29  ;;  %v601_v33 = vmax.f32 %v499_v26, 0.0 }
 0x1cc   :  { %v604_v32 = vmax.f32 %v510_v28, 0.0 }
 0x1cd   :  { %v602_v34 = vmax.f32 %v502_v30, 0.0 }
 0x1ce   :  { %v630_v35 = vpack.c.bf16 %v604_v32, %v603_v31 }
 0x1cf   :  { %v629_v36 = vpack.c.bf16 %v602_v34, %v601_v33  ;;  %v1517_v37 = vpop.f32.mrb[12].mxu1 }
 0x1d0   :  { %v523_v38 = vadd.f32 %v1517_v37, %v2010_v57  ;;  %v514_v39 = vpop.f32.mrb[13].mxu1 }
 0x1d1   :  { %v515_v40 = vadd.f32 %v2010_v57, %v514_v39  ;;  %v1518_v41 = vpop.f32.mrb[14].mxu1  ;;  %1559 = vmatprep.mubr.bf16.mxu0 %v629_v36 }
 0x1d2   :  { %v526_v42 = vadd.f32 %v1518_v41, %v2010_v57  ;;  %v517_v43 = vpop.f32.mrb[15].mxu1  ;;  %1560 = vmatmul.mubr.bf16.gmra.mrb[40].mxu0 %v630_v35  ;;  %v607_v45 = vmax.f32 %v523_v38, 0.0 }
 0x1d3   :  { %v518_v44 = vadd.f32 %v2010_v57, %v517_v43  ;;  %v605_v47 = vmax.f32 %v515_v40, 0.0 }
 0x1d4   :  { %v608_v46 = vmax.f32 %v526_v42, 0.0 }
 0x1d5   :  { %v606_v48 = vmax.f32 %v518_v44, 0.0  ;;  %v1698_v44 = vld [vmem:[%s2167_s7 + $0x38] sm:$0xff]  }
 0x1d6   :  { %v632_v49 = vpack.c.bf16 %v608_v46, %v607_v45  ;;  %1597 = vmatprep.subr.bf16.mxu1 %v1698_v44  ;;  %v2050_v45 = vld [vmem:[%s2166_s6] ss:$0 sm:$0xff] }
 0x1d7   :  { %v631_v50 = vpack.c.bf16 %v606_v48, %v605_v47  ;;  %v1521_v51 = vpop.f32.mrb[16].mxu1  ;;  %1598 = vmatpush3.bf16.msra.mxu1 %v1698_v44 }
 0x1d8   :  { %v539_v0 = vadd.f32 %v1521_v51, %v2010_v57  ;;  %v530_v52 = vpop.f32.mrb[17].mxu1 }
 0x1d9   :  { %v531_v53 = vadd.f32 %v2010_v57, %v530_v52  ;;  %v1522_v54 = vpop.f32.mrb[18].mxu1  ;;  %1563 = vmatprep.mubr.bf16.mxu0 %v631_v50 }
 0x1da   :  { %v542_v55 = vadd.f32 %v1522_v54, %v2010_v57  ;;  %v533_v56 = vpop.f32.mrb[19].mxu1  ;;  %1564 = vmatmul.mubr.bf16.gmra.mrb[44].mxu0 %v632_v49  ;;  %v611_v59 = vmax.f32 %v539_v0, 0.0 }
 0x1db   :  { %v534_v58 = vadd.f32 %v2010_v57, %v533_v56  ;;  %v609_v61 = vmax.f32 %v531_v53, 0.0 }
 0x1dc   :  { %v612_v60 = vmax.f32 %v542_v55, 0.0 }
 0x1dd   :  { %v610_v62 = vmax.f32 %v534_v58, 0.0 }
 0x1de   :  { %v634_v63 = vpack.c.bf16 %v612_v60, %v611_v59 }
 0x1df   :  { %v633_v1 = vpack.c.bf16 %v610_v62, %v609_v61  ;;  %v1525_v2 = vpop.f32.mrb[20].mxu1 }
 0x1e0   :  { %v555_v3 = vadd.f32 %v1525_v2, %v2010_v57  ;;  %v546_v4 = vpop.f32.mrb[21].mxu1 }
 0x1e1   :  { %v547_v5 = vadd.f32 %v2010_v57, %v546_v4  ;;  %v1526_v6 = vpop.f32.mrb[22].mxu1  ;;  %1567 = vmatprep.mubr.bf16.mxu0 %v633_v1 }
 0x1e2   :  { %v615_v7 = vmax.f32 %v555_v3, 0.0  ;;  %v558_v8 = vadd.f32 %v1526_v6, %v2010_v57  ;;  %v549_v9 = vpop.f32.mrb[23].mxu1  ;;  %1568 = vmatmul.mubr.bf16.gmra.mrb[48].mxu0 %v634_v63 }
 0x1e3   :  { %v613_v10 = vmax.f32 %v547_v5, 0.0  ;;  %v550_v11 = vadd.f32 %v2010_v57, %v549_v9 }
 0x1e4   :  { %v616_v12 = vmax.f32 %v558_v8, 0.0 }
 0x1e5   :  { %v614_v13 = vmax.f32 %v550_v11, 0.0 }
 0x1e6   :  { %v636_v14 = vpack.c.bf16 %v616_v12, %v615_v7 }
 0x1e7   :  { %v635_v15 = vpack.c.bf16 %v614_v13, %v613_v10  ;;  %v1529_v16 = vpop.f32.mrb[24].mxu1 }
 0x1e8   :  { %v571_v17 = vadd.f32 %v1529_v16, %v2010_v57  ;;  %v562_v18 = vpop.f32.mrb[25].mxu1 }
 0x1e9   :  { %v563_v19 = vadd.f32 %v2010_v57, %v562_v18  ;;  %1571 = vmatprep.mubr.bf16.mxu0 %v635_v15  ;;  %v1530_v20 = vpop.f32.mrb[26].mxu1 }
 0x1ea   :  { %v619_v21 = vmax.f32 %v571_v17, 0.0  ;;  %v574_v22 = vadd.f32 %v1530_v20, %v2010_v57  ;;  %1572 = vmatmul.mubr.bf16.gmra.mrb[52].mxu0 %v636_v14  ;;  %v565_v23 = vpop.f32.mrb[27].mxu1 }
 0x1eb   :  { %v617_v24 = vmax.f32 %v563_v19, 0.0  ;;  %v566_v25 = vadd.f32 %v2010_v57, %v565_v23 }
 0x1ec   :  { %v620_v26 = vmax.f32 %v574_v22, 0.0 }
 0x1ed   :  { %v618_v27 = vmax.f32 %v566_v25, 0.0 }
 0x1ee   :  { %v638_v28 = vpack.c.bf16 %v620_v26, %v619_v21 }
 0x1ef   :  { %v637_v29 = vpack.c.bf16 %v618_v27, %v617_v24  ;;  %v1533_v30 = vpop.f32.mrb[28].mxu1 }
 0x1f0   :  { %v587_v31 = vadd.f32 %v1533_v30, %v2010_v57  ;;  %v578_v32 = vpop.f32.mrb[29].mxu1 }
 0x1f1   :  { %1575 = vmatprep.mubr.bf16.mxu0 %v637_v29  ;;  %v579_v33 = vadd.f32 %v2010_v57, %v578_v32  ;;  %v1534_v34 = vpop.f32.mrb[30].mxu1 }
 0x1f2   :  { %1576 = vmatmul.mubr.bf16.gmra.mrb[56].mxu0 %v638_v28  ;;  %v623_v35 = vmax.f32 %v587_v31, 0.0  ;;  %v590_v36 = vadd.f32 %v1534_v34, %v2010_v57  ;;  %v581_v37 = vpop.f32.mrb[31].mxu1 }
 0x1f3   :  { %v621_v38 = vmax.f32 %v579_v33, 0.0  ;;  %v582_v39 = vadd.f32 %v2010_v57, %v581_v37 }
 0x1f4   :  { %v624_v40 = vmax.f32 %v590_v36, 0.0 }
 0x1f5   :  { %v622_v41 = vmax.f32 %v582_v39, 0.0 }
 0x1f6   :  { %v640_v42 = vpack.c.bf16 %v624_v40, %v623_v35 }
 0x1f7   :  { %v639_v43 = vpack.c.bf16 %v622_v41, %v621_v38 }
 0x1f9   :  { %1579 = vmatprep.mubr.bf16.mxu0 %v639_v43 }
 0x1fa   :  { %1580 = vmatmul.mubr.bf16.gmra.mrb[60].mxu0 %v640_v42 }
 0x295   :  { %v1553_v46 = vpop.f32.mrb[32].mxu0 }
 0x296   :  { %v755_v57 = vadd.f32 %v1553_v46, %v2050_v45  ;;  %v746_v47 = vpop.f32.mrb[33].mxu0 }
 0x297   :  { %v747_v48 = vadd.f32 %v2050_v45, %v746_v47  ;;  %v1554_v49 = vpop.f32.mrb[34].mxu0 }
 0x298   :  { %v758_v50 = vadd.f32 %v1554_v49, %v2050_v45  ;;  %v749_v51 = vpop.f32.mrb[35].mxu0  ;;  %v875_v52 = vmax.f32 %v755_v57, 0.0 }
 0x299   :  { %v750_v0 = vadd.f32 %v2050_v45, %v749_v51  ;;  %v873_v54 = vmax.f32 %v747_v48, 0.0 }
 0x29a   :  { %v876_v53 = vmax.f32 %v758_v50, 0.0 }
 0x29b   :  { %v874_v55 = vmax.f32 %v750_v0, 0.0 }
 0x29c   :  { %v906_v56 = vpack.c.bf16 %v876_v53, %v875_v52 }
 0x29d   :  { %v905_v58 = vpack.c.bf16 %v874_v55, %v873_v54  ;;  %v1557_v59 = vpop.f32.mrb[36].mxu0 }
 0x29e   :  { %v771_v60 = vadd.f32 %v1557_v59, %v2050_v45  ;;  %v762_v61 = vpop.f32.mrb[37].mxu0 }
 0x29f   :  { %v763_v62 = vadd.f32 %v2050_v45, %v762_v61  ;;  %v1558_v63 = vpop.f32.mrb[38].mxu0  ;;  %1599 = vmatprep.mubr.bf16.mxu1 %v905_v58 }
 0x2a0   :  { %v774_v1 = vadd.f32 %v1558_v63, %v2050_v45  ;;  %v765_v2 = vpop.f32.mrb[39].mxu0  ;;  %1600 = vmatmul.mubr.bf16.vlgmr.msra.gmra.mrb[32].mxu1 %v906_v56  ;;  %v879_v4 = vmax.f32 %v771_v60, 0.0 }
 0x2a1   :  { %v766_v3 = vadd.f32 %v2050_v45, %v765_v2  ;;  %v877_v6 = vmax.f32 %v763_v62, 0.0 }
 0x2a2   :  { %v880_v5 = vmax.f32 %v774_v1, 0.0 }
 0x2a3   :  { %v878_v7 = vmax.f32 %v766_v3, 0.0 }
 0x2a4   :  { %v908_v8 = vpack.c.bf16 %v880_v5, %v879_v4 }
 0x2a5   :  { %v907_v9 = vpack.c.bf16 %v878_v7, %v877_v6  ;;  %v1561_v10 = vpop.f32.mrb[40].mxu0 }
 0x2a6   :  { %v787_v11 = vadd.f32 %v1561_v10, %v2050_v45  ;;  %v778_v12 = vpop.f32.mrb[41].mxu0 }
 0x2a7   :  { %v779_v13 = vadd.f32 %v2050_v45, %v778_v12  ;;  %v1562_v14 = vpop.f32.mrb[42].mxu0  ;;  %1603 = vmatprep.mubr.bf16.mxu1 %v907_v9 }
 0x2a8   :  { %v790_v15 = vadd.f32 %v1562_v14, %v2050_v45  ;;  %v781_v16 = vpop.f32.mrb[43].mxu0  ;;  %1604 = vmatmul.mubr.bf16.gmra.mrb[36].mxu1 %v908_v8  ;;  %v883_v18 = vmax.f32 %v787_v11, 0.0 }
 0x2a9   :  { %v782_v17 = vadd.f32 %v2050_v45, %v781_v16  ;;  %v881_v20 = vmax.f32 %v779_v13, 0.0 }
 0x2aa   :  { %v884_v19 = vmax.f32 %v790_v15, 0.0 }
 0x2ab   :  { %v882_v21 = vmax.f32 %v782_v17, 0.0 }
 0x2ac   :  { %v910_v22 = vpack.c.bf16 %v884_v19, %v883_v18 }
 0x2ad   :  { %v909_v23 = vpack.c.bf16 %v882_v21, %v881_v20  ;;  %v1565_v24 = vpop.f32.mrb[44].mxu0 }
 0x2ae   :  { %v803_v25 = vadd.f32 %v1565_v24, %v2050_v45  ;;  %v794_v26 = vpop.f32.mrb[45].mxu0 }
 0x2af   :  { %v795_v27 = vadd.f32 %v2050_v45, %v794_v26  ;;  %v1566_v28 = vpop.f32.mrb[46].mxu0  ;;  %1607 = vmatprep.mubr.bf16.mxu1 %v909_v23 }
 0x2b0   :  { %v806_v29 = vadd.f32 %v1566_v28, %v2050_v45  ;;  %v797_v30 = vpop.f32.mrb[47].mxu0  ;;  %1608 = vmatmul.mubr.bf16.gmra.mrb[40].mxu1 %v910_v22  ;;  %v887_v32 = vmax.f32 %v803_v25, 0.0 }
 0x2b1   :  { %v798_v31 = vadd.f32 %v2050_v45, %v797_v30  ;;  %v885_v34 = vmax.f32 %v795_v27, 0.0 }
 0x2b2   :  { %v888_v33 = vmax.f32 %v806_v29, 0.0 }
 0x2b3   :  { %v886_v35 = vmax.f32 %v798_v31, 0.0  ;;  %v1723_v31 = vmov 0.0  }
 0x2b4   :  { %v912_v36 = vpack.c.bf16 %v888_v33, %v887_v32  ;;  %1631 = vmatprep.subr.bf16.mxu0 %v1723_v31  ;;  %1651 = vmatprep.subr.bf16.mxu1 %v1723_v31 }
 0x2b5   :  { %v911_v37 = vpack.c.bf16 %v886_v35, %v885_v34  ;;  %v1569_v38 = vpop.f32.mrb[48].mxu0  ;;  %1647 = vmatprep.mubr.msk.bf16.mxu0 %vm1724_vm1, %v1723_v31 }
 0x2b6   :  { %v819_v39 = vadd.f32 %v1569_v38, %v2050_v45  ;;  %v810_v40 = vpop.f32.mrb[49].mxu0 }
 0x2b7   :  { %v811_v41 = vadd.f32 %v2050_v45, %v810_v40  ;;  %v1570_v42 = vpop.f32.mrb[50].mxu0  ;;  %1611 = vmatprep.mubr.bf16.mxu1 %v911_v37 }
 0x2b8   :  { %v822_v43 = vadd.f32 %v1570_v42, %v2050_v45  ;;  %v813_v44 = vpop.f32.mrb[51].mxu0  ;;  %1612 = vmatmul.mubr.bf16.gmra.mrb[44].mxu1 %v912_v36  ;;  %v891_v57 = vmax.f32 %v819_v39, 0.0 }
 0x2b9   :  { %v814_v46 = vadd.f32 %v2050_v45, %v813_v44  ;;  %v889_v48 = vmax.f32 %v811_v41, 0.0 }
 0x2ba   :  { %v892_v47 = vmax.f32 %v822_v43, 0.0 }
 0x2bb   :  { %v890_v49 = vmax.f32 %v814_v46, 0.0 }
 0x2bc   :  { %v914_v50 = vpack.c.bf16 %v892_v47, %v891_v57 }
 0x2bd   :  { %v913_v51 = vpack.c.bf16 %v890_v49, %v889_v48  ;;  %v1573_v0 = vpop.f32.mrb[52].mxu0 }
 0x2be   :  { %v835_v52 = vadd.f32 %v1573_v0, %v2050_v45  ;;  %v826_v53 = vpop.f32.mrb[53].mxu0 }
 0x2bf   :  { %v827_v54 = vadd.f32 %v2050_v45, %v826_v53  ;;  %v1574_v55 = vpop.f32.mrb[54].mxu0  ;;  %1615 = vmatprep.mubr.bf16.mxu1 %v913_v51 }
 0x2c0   :  { %v838_v56 = vadd.f32 %v1574_v55, %v2050_v45  ;;  %v829_v58 = vpop.f32.mrb[55].mxu0  ;;  %1616 = vmatmul.mubr.bf16.gmra.mrb[48].mxu1 %v914_v50  ;;  %v895_v60 = vmax.f32 %v835_v52, 0.0 }
 0x2c1   :  { %v830_v59 = vadd.f32 %v2050_v45, %v829_v58  ;;  %v893_v62 = vmax.f32 %v827_v54, 0.0 }
 0x2c2   :  { %v896_v61 = vmax.f32 %v838_v56, 0.0 }
 0x2c3   :  { %v894_v63 = vmax.f32 %v830_v59, 0.0 }
 0x2c4   :  { %v916_v1 = vpack.c.bf16 %v896_v61, %v895_v60 }
 0x2c5   :  { %v915_v2 = vpack.c.bf16 %v894_v63, %v893_v62  ;;  %v1577_v3 = vpop.f32.mrb[56].mxu0 }
 0x2c6   :  { %v851_v4 = vadd.f32 %v1577_v3, %v2050_v45  ;;  %v842_v5 = vpop.f32.mrb[57].mxu0 }
 0x2c7   :  { %v843_v6 = vadd.f32 %v2050_v45, %v842_v5  ;;  %1619 = vmatprep.mubr.bf16.mxu1 %v915_v2  ;;  %v1578_v7 = vpop.f32.mrb[58].mxu0 }
 0x2c8   :  { %v899_v8 = vmax.f32 %v851_v4, 0.0  ;;  %v854_v9 = vadd.f32 %v1578_v7, %v2050_v45  ;;  %1620 = vmatmul.mubr.bf16.gmra.mrb[52].mxu1 %v916_v1  ;;  %v845_v10 = vpop.f32.mrb[59].mxu0 }
 0x2c9   :  { %v897_v11 = vmax.f32 %v843_v6, 0.0  ;;  %v846_v12 = vadd.f32 %v2050_v45, %v845_v10 }
 0x2ca   :  { %v900_v13 = vmax.f32 %v854_v9, 0.0 }
 0x2cb   :  { %v898_v14 = vmax.f32 %v846_v12, 0.0 }
 0x2cc   :  { %v918_v15 = vpack.c.bf16 %v900_v13, %v899_v8 }
 0x2cd   :  { %v917_v16 = vpack.c.bf16 %v898_v14, %v897_v11  ;;  %v1581_v17 = vpop.f32.mrb[60].mxu0 }
 0x2ce   :  { %v867_v18 = vadd.f32 %v1581_v17, %v2050_v45  ;;  %v858_v19 = vpop.f32.mrb[61].mxu0 }
 0x2cf   :  { %1623 = vmatprep.mubr.bf16.mxu1 %v917_v16  ;;  %v859_v20 = vadd.f32 %v2050_v45, %v858_v19  ;;  %v1582_v21 = vpop.f32.mrb[62].mxu0 }
 0x2d0   :  { %1624 = vmatmul.mubr.bf16.gmra.mrb[56].mxu1 %v918_v15  ;;  %v903_v22 = vmax.f32 %v867_v18, 0.0  ;;  %v870_v23 = vadd.f32 %v1582_v21, %v2050_v45  ;;  %v861_v24 = vpop.f32.mrb[63].mxu0 }
 0x2d1   :  { %v901_v25 = vmax.f32 %v859_v20, 0.0  ;;  %v862_v26 = vadd.f32 %v2050_v45, %v861_v24  ;;  %v2091_v45 = vld [vmem:[%s2168_s8] ss:$0 sm:$0xff] }
 0x2d2   :  { %v904_v27 = vmax.f32 %v870_v23, 0.0 }
 0x2d3   :  { %v902_v28 = vmax.f32 %v862_v26, 0.0 }
 0x2d4   :  { %v920_v29 = vpack.c.bf16 %v904_v27, %v903_v22 }
 0x2d5   :  { %v919_v30 = vpack.c.bf16 %v902_v28, %v901_v25 }
 0x2d7   :  { %1627 = vmatprep.mubr.bf16.mxu1 %v919_v30 }
 0x2d8   :  { %1628 = vmatmul.mubr.bf16.gmra.mrb[60].mxu1 %v920_v29 }
 0x2d9   :  { %1667 = vmatprep.mubr.msk.bf16.mxu1 %vm1724_vm1, %v1723_v31 }
 0x373   :  { %v1601_v32 = vpop.f32.mrb[32].mxu1 }
 0x374   :  { %v1035_v33 = vadd.f32 %v1601_v32, %v2091_v45  ;;  %v1026_v34 = vpop.f32.mrb[33].mxu1 }
 0x375   :  { %v1027_v35 = vadd.f32 %v2091_v45, %v1026_v34  ;;  %v1602_v36 = vpop.f32.mrb[34].mxu1 }
 0x376   :  { %v1038_v37 = vadd.f32 %v1602_v36, %v2091_v45  ;;  %v1029_v38 = vpop.f32.mrb[35].mxu1  ;;  %v1155_v40 = vmax.f32 %v1035_v33, 0.0 }
 0x377   :  { %v1030_v39 = vadd.f32 %v2091_v45, %v1029_v38  ;;  %v1153_v42 = vmax.f32 %v1027_v35, 0.0 }
 0x378   :  { %v1156_v41 = vmax.f32 %v1038_v37, 0.0 }
 0x379   :  { %v1154_v43 = vmax.f32 %v1030_v39, 0.0 }
 0x37a   :  { %v1186_v44 = vpack.c.bf16 %v1156_v41, %v1155_v40 }
 0x37b   :  { %v1185_v46 = vpack.c.bf16 %v1154_v43, %v1153_v42  ;;  %v1605_v57 = vpop.f32.mrb[36].mxu1 }
 0x37c   :  { %v1051_v47 = vadd.f32 %v1605_v57, %v2091_v45  ;;  %v1042_v48 = vpop.f32.mrb[37].mxu1 }
 0x37d   :  { %v1043_v49 = vadd.f32 %v2091_v45, %v1042_v48  ;;  %v1606_v50 = vpop.f32.mrb[38].mxu1  ;;  %1632 = vmatpush3.bf16.xpose.msra.mxu0 %v1185_v46 }
 0x37e   :  { %v1054_v51 = vadd.f32 %v1606_v50, %v2091_v45  ;;  %v1045_v0 = vpop.f32.mrb[39].mxu1  ;;  %1633 = vmatprep.subr.bf16.mxu0 %v1723_v31  ;;  %v1159_v53 = vmax.f32 %v1051_v47, 0.0 }
 0x37f   :  { %v1046_v52 = vadd.f32 %v2091_v45, %v1045_v0  ;;  %v1157_v55 = vmax.f32 %v1043_v49, 0.0 }
 0x380   :  { %v1160_v54 = vmax.f32 %v1054_v51, 0.0 }
 0x381   :  { %v1158_v56 = vmax.f32 %v1046_v52, 0.0 }
 0x382   :  { %v1188_v58 = vpack.c.bf16 %v1160_v54, %v1159_v53 }
 0x383   :  { %v1187_v59 = vpack.c.bf16 %v1158_v56, %v1157_v55  ;;  %v1609_v60 = vpop.f32.mrb[40].mxu1 }
 0x384   :  { %v1067_v61 = vadd.f32 %v1609_v60, %v2091_v45  ;;  %v1058_v62 = vpop.f32.mrb[41].mxu1 }
 0x385   :  { %v1059_v63 = vadd.f32 %v2091_v45, %v1058_v62  ;;  %v1610_v1 = vpop.f32.mrb[42].mxu1  ;;  %1634 = vmatpush3.bf16.xpose.msra.mxu0 %v1186_v44 }
 0x386   :  { %v1070_v2 = vadd.f32 %v1610_v1, %v2091_v45  ;;  %v1061_v3 = vpop.f32.mrb[43].mxu1  ;;  %1635 = vmatprep.subr.bf16.mxu0 %v1723_v31  ;;  %v1163_v5 = vmax.f32 %v1067_v61, 0.0 }
 0x387   :  { %v1062_v4 = vadd.f32 %v2091_v45, %v1061_v3  ;;  %v1161_v7 = vmax.f32 %v1059_v63, 0.0 }
 0x388   :  { %v1164_v6 = vmax.f32 %v1070_v2, 0.0 }
 0x389   :  { %v1162_v8 = vmax.f32 %v1062_v4, 0.0 }
 0x38a   :  { %v1190_v9 = vpack.c.bf16 %v1164_v6, %v1163_v5 }
 0x38b   :  { %v1189_v10 = vpack.c.bf16 %v1162_v8, %v1161_v7  ;;  %v1613_v11 = vpop.f32.mrb[44].mxu1 }
 0x38c   :  { %v1083_v12 = vadd.f32 %v1613_v11, %v2091_v45  ;;  %v1074_v13 = vpop.f32.mrb[45].mxu1 }
 0x38d   :  { %v1075_v14 = vadd.f32 %v2091_v45, %v1074_v13  ;;  %v1614_v15 = vpop.f32.mrb[46].mxu1  ;;  %1636 = vmatpush3.bf16.xpose.msra.mxu0 %v1187_v59 }
 0x38e   :  { %v1086_v16 = vadd.f32 %v1614_v15, %v2091_v45  ;;  %v1077_v17 = vpop.f32.mrb[47].mxu1  ;;  %1637 = vmatprep.subr.bf16.mxu0 %v1723_v31  ;;  %v1167_v19 = vmax.f32 %v1083_v12, 0.0 }
 0x38f   :  { %v1078_v18 = vadd.f32 %v2091_v45, %v1077_v17  ;;  %v1165_v21 = vmax.f32 %v1075_v14, 0.0 }
 0x390   :  { %v1168_v20 = vmax.f32 %v1086_v16, 0.0 }
 0x391   :  { %v1166_v22 = vmax.f32 %v1078_v18, 0.0 }
 0x392   :  { %v2112_v23 = vpack.c.bf16 %v1168_v20, %v1167_v19  ;;  %v1201_v19 = vld [vmem:[%s2169_s9] sm:$0xf]  ;;  %s1725_s9 = smov [#allocation2]  }
 0x393   :  { %v1191_v24 = vpack.c.bf16 %v1166_v22, %v1165_v21  ;;  %v1617_v25 = vpop.f32.mrb[48].mxu1  ;;  %s1293_s2 = sshll.u32 %s1725_s9, 4  ;;  %s1294_s2 = int_to_ptr.vmem [resolvable:$true] %s1293_s2 }
 0x394   :  { %v1099_v26 = vadd.f32 %v1617_v25, %v2091_v45  ;;  %v1090_v27 = vpop.f32.mrb[49].mxu1  ;;  %s1699_s13 = scalar_lea.vmem %s1294_s2, 32  ;;  %p1704_p1 = scmp.lt.s32.totalorder %s1294_s2, %s1294_s2 }
 0x395   :  { %v1091_v28 = vadd.f32 %v2091_v45, %v1090_v27  ;;  %v1618_v29 = vpop.f32.mrb[50].mxu1  ;;  %1638 = vmatpush3.bf16.xpose.msra.mxu0 %v1188_v58  ;;  %p1700_p0 = scmp.ne.s32.totalorder %s1294_s2, %s1699_s13  ;;  %p1705_p2 = scmp.lt.s32.totalorder %s1699_s13, %s1699_s13 }
 0x396   :  { %v1102_v30 = vadd.f32 %v1618_v29, %v2091_v45  ;;  %v1093_v32 = vpop.f32.mrb[51].mxu1  ;;  %1639 = vmatprep.subr.bf16.mxu0 %v1723_v31  ;;  %v1171_v34 = vmax.f32 %v1099_v26, 0.0 }
 0x397   :  { %v1094_v33 = vadd.f32 %v2091_v45, %v1093_v32  ;;  %v1169_v36 = vmax.f32 %v1091_v28, 0.0  ;;  %p1706_p3 = por %p1705_p2, %p1704_p1 }
 0x398   :  { %v1172_v35 = vmax.f32 %v1102_v30, 0.0 }
 0x399   :  { %v1170_v37 = vmax.f32 %v1094_v33, 0.0  ;;  %p1707_p4 = pnand %p1706_p3, %p1700_p0 }
 0x39a   :  { %v1194_v38 = vpack.c.bf16 %v1172_v35, %v1171_v34 }
 0x39b   :  { %v1193_v39 = vpack.c.bf16 %v1170_v37, %v1169_v36  ;;  %v1621_v40 = vpop.f32.mrb[52].mxu1 }
 0x39c   :  { %v1115_v41 = vadd.f32 %v1621_v40, %v2091_v45  ;;  %v1106_v42 = vpop.f32.mrb[53].mxu1 }
 0x39d   :  { %v1107_v43 = vadd.f32 %v2091_v45, %v1106_v42  ;;  %v1622_v44 = vpop.f32.mrb[54].mxu1  ;;  %1640 = vmatpush3.bf16.xpose.msra.mxu0 %v1189_v10  ;;  %1652 = vmatpush3.bf16.xpose.msra.mxu1 %v1193_v39 }
 0x39e   :  { %v1118_v46 = vadd.f32 %v1622_v44, %v2091_v45  ;;  %v1109_v57 = vpop.f32.mrb[55].mxu1  ;;  %1641 = vmatprep.subr.bf16.mxu0 %v1723_v31  ;;  %1653 = vmatprep.subr.bf16.mxu1 %v1723_v31  ;;  %v1175_v48 = vmax.f32 %v1115_v41, 0.0 }
 0x39f   :  { %v1110_v47 = vadd.f32 %v2091_v45, %v1109_v57  ;;  %v1173_v50 = vmax.f32 %v1107_v43, 0.0 }
 0x3a0   :  { %v1176_v49 = vmax.f32 %v1118_v46, 0.0 }
 0x3a1   :  { %v1174_v51 = vmax.f32 %v1110_v47, 0.0 }
 0x3a2   :  { %v1196_v0 = vpack.c.bf16 %v1176_v49, %v1175_v48 }
 0x3a3   :  { %v1195_v52 = vpack.c.bf16 %v1174_v51, %v1173_v50  ;;  %v1625_v53 = vpop.f32.mrb[56].mxu1 }
 0x3a4   :  { %v1131_v54 = vadd.f32 %v1625_v53, %v2091_v45  ;;  %v1122_v55 = vpop.f32.mrb[57].mxu1 }
 0x3a5   :  { %v1123_v56 = vadd.f32 %v2091_v45, %v1122_v55  ;;  %1642 = vmatpush3.bf16.xpose.msra.mxu0 %v1190_v9  ;;  %1654 = vmatpush3.bf16.xpose.msra.mxu1 %v1194_v38  ;;  %v1626_v58 = vpop.f32.mrb[58].mxu1 }
 0x3a6   :  { %v1179_v59 = vmax.f32 %v1131_v54, 0.0  ;;  %v1134_v60 = vadd.f32 %v1626_v58, %v2091_v45  ;;  %v1125_v61 = vpop.f32.mrb[59].mxu1  ;;  %1643 = vmatprep.subr.bf16.mxu0 %v1723_v31  ;;  %1655 = vmatprep.subr.bf16.mxu1 %v1723_v31 }
 0x3a7   :  { %v1177_v62 = vmax.f32 %v1123_v56, 0.0  ;;  %v1126_v63 = vadd.f32 %v2091_v45, %v1125_v61 }
 0x3a8   :  { %v1180_v1 = vmax.f32 %v1134_v60, 0.0 }
 0x3a9   :  { %v1178_v2 = vmax.f32 %v1126_v63, 0.0 }
 0x3aa   :  { %v1198_v3 = vpack.c.bf16 %v1180_v1, %v1179_v59 }
 0x3ab   :  { %v1197_v4 = vpack.c.bf16 %v1178_v2, %v1177_v62  ;;  %v1629_v5 = vpop.f32.mrb[60].mxu1 }
 0x3ac   :  { %v1147_v6 = vadd.f32 %v1629_v5, %v2091_v45  ;;  %v1138_v7 = vpop.f32.mrb[61].mxu1 }
 0x3ad   :  { %1644 = vmatpush3.bf16.xpose.msra.mxu0 %v1191_v24  ;;  %1656 = vmatpush3.bf16.xpose.msra.mxu1 %v1195_v52  ;;  %v1139_v8 = vadd.f32 %v2091_v45, %v1138_v7  ;;  %v1630_v9 = vpop.f32.mrb[62].mxu1 }
 0x3ae   :  { %v1183_v10 = vmax.f32 %v1147_v6, 0.0  ;;  %1645 = vmatprep.subr.bf16.mxu0 %v1723_v31  ;;  %1657 = vmatprep.subr.bf16.mxu1 %v1723_v31  ;;  %v1150_v11 = vadd.f32 %v1630_v9, %v2091_v45  ;;  %v1141_v12 = vpop.f32.mrb[63].mxu1 }
 0x3af   :  { %v1181_v13 = vmax.f32 %v1139_v8, 0.0  ;;  %v1142_v14 = vadd.f32 %v2091_v45, %v1141_v12  ;;  %v1202_v45 = vld [vmem:[%s2170_s10] sm:$0x1] }
 0x3b0   :  { %v1184_v15 = vmax.f32 %v1150_v11, 0.0 }
 0x3b1   :  { %v1182_v16 = vmax.f32 %v1142_v14, 0.0 }
 0x3b2   :  { %v1200_v17 = vpack.c.bf16 %v1184_v15, %v1183_v10 }
 0x3b3   :  { %v1199_v18 = vpack.c.bf16 %v1182_v16, %v1181_v13 }
 0x3b5   :  { %1646 = vmatpush3.bf16.xpose.msra.mxu0 %v2112_v23  ;;  %1658 = vmatpush3.bf16.xpose.msra.mxu1 %v1196_v0 }
 0x3b6   :  { %1659 = vmatprep.subr.bf16.mxu1 %v1723_v31 }
 0x3bc   :  { %1648 = vmatmul.mubr.bf16.vlgmr.msra.gmra.mrb[64].mxu0 %v1201_v19 }
 0x3bd   :  { %1660 = vmatpush3.bf16.xpose.msra.mxu1 %v1197_v4 }
 0x3be   :  { %1661 = vmatprep.subr.bf16.mxu1 %v1723_v31 }
 0x3c5   :  { %1662 = vmatpush3.bf16.xpose.msra.mxu1 %v1198_v3 }
 0x3c6   :  { %1663 = vmatprep.subr.bf16.mxu1 %v1723_v31 }
 0x3cd   :  { %1664 = vmatpush3.bf16.xpose.msra.mxu1 %v1199_v18 }
 0x3ce   :  { %1665 = vmatprep.subr.bf16.mxu1 %v1723_v31 }
 0x3d5   :  { %1666 = vmatpush3.bf16.xpose.msra.mxu1 %v1200_v17 }
 0x3dc   :  { %1668 = vmatmul.mubr.bf16.vlgmr.msra.gmra.mrb[64].mxu1 %v1201_v19 }
 0x48f   :  { %v1237_v20 = vpop.f32.mrb[64].mxu0 }
 0x490   :  { %v1243_v21 = vadd.f32 %v1237_v20, %v1202_v45  ;;  %v1649_v22 = vpop.f32.mrb[65].mxu0 }
 0x491   :  { %v1240_v23 = vpop.f32.mrb[66].mxu0 }
 0x492   :  { %1244 = vst [vmem:[#allocation2] sm:$0x1] %v1243_v21  ;;  %v1650_v24 = vpop.f32.mrb[67].mxu0 }
 0x4af   :  { %v1279_v25 = vpop.f32.mrb[64].mxu1 }
 0x4b0   :  { %v1285_v26 = vadd.f32 %v1279_v25, %v1202_v45  ;;  %v1669_v27 = vpop.f32.mrb[65].mxu1 }
 0x4b1   :  { %v1282_v28 = vpop.f32.mrb[66].mxu1 }
 0x4b2   :  { %1286 = vst [vmem:[#allocation2 + $0x1] sm:$0x1] %v1285_v26  ;;  %v1670_v31 = vpop.f32.mrb[67].mxu1 }
 0x4b3   :  { %1710 = shalt.err (!%p1707_p4)
}
 0x4b4   :  { %s1711_s15 = scalar_lea.hbm %s2171_s11, 32 }
 0x4b5   :  { %p1712_p5 = scmp.ne.s32.totalorder %s2171_s11, %s1711_s15  ;;  %p1715_p6 = scmp.lt.u32.totalorder %s1711_s15, %s2171_s11 }
 0x4b7   :  { %p1717_p7 = pnand %p1715_p6, %p1712_p5 }
 0x4b9   :  { %1720 = shalt.err (!%p1717_p7)
}
 0x4ba   :  { %1296 = dma.vmem_to_hbm [thread:$0]  %s1294_s2, 32, %s2171_s11, [#allocation3]  }
 0x4bb   :  { %1721 = dma.done.wait [#allocation3], 32  }
 0x4bc   :  { %1722 = vsyncadd [#allocation3], 4294967264 }
 0x4bd   :  { %1300 = vsyncpa [#allocation3], 1 }

</bundles_post_ra>
